<compile_context>
chip_gen: v7x
topology: tpu7x:2x2x1
jax: 0.10.0
libtpu: 0.0.40
codegen_flags: <defaults>
</compile_context>

<pallas_src>
import numpy as np
import jax
import jax.numpy as jnp
from jax.experimental import pallas as pl
from jax.experimental.pallas import tpu as pltpu

_TB_MAX = 65536  # batch rows per grid step; bf16 slab double-buffered ~= 11 MiB


def _nfm_kernel(act_ref, lin_ref, w_cat_ref, b_cat_ref, w1_ref, b1_ref, w2_ref, out_ref):
    H, E = w1_ref.shape
    C = w_cat_ref.shape[1]

    # Single bf16 load of the streamed activation slab; up-cast once to f32 for the VPU
    # (v5e has no bf16 VPU) and keep all cancellation-sensitive arithmetic in f32.
    act = act_ref[...].astype(jnp.float32)                             # (2E+C, TB)
    sum_emb = act[:E, :]                                               # (E, TB)
    sum_sq = act[E:2 * E, :]                                           # (E, TB)
    conti = act[2 * E:, :]                                             # (C, TB)

    # Fused emb_linear / add_linear on the continuous features:
    #   rows [0:E] -> emb_linear(conti) (with bias); row [E] -> add_linear(conti) (bias 0).
    r = jnp.dot(w_cat_ref[...], conti,
                preferred_element_type=jnp.float32) + b_cat_ref[...]   # (E+1, TB)
    added = r[:E, :]                                                   # (E, TB)
    add_term = r[E:, :]                                                # (1, TB)

    # FM cross term over [gathered field embeddings ++ added_emb]:
    #   0.5 * ((sum_f v_f)^2 - sum_f v_f^2); field sums precomputed in the wrapper.
    s = sum_emb + added                                                # (E, TB)
    q = sum_sq + added * added                                         # (E, TB)
    cross = 0.5 * (s * s - q)                                          # (E, TB)

    # MLP: Linear(E->H) -> ReLU -> Linear(H->1); both eval-mode BNs folded into w1/b1.
    h = jnp.dot(w1_ref[...], cross,
                preferred_element_type=jnp.float32) + b1_ref[...]      # (H, TB)
    h = jnp.maximum(h, 0.0)
    mlp_out = jnp.dot(w2_ref[...], h,
                      preferred_element_type=jnp.float32)              # (1, TB)

    # lin_ref already contains sum_f(linear weights) + lin_bias + mlp bias b2.
    out_ref[...] = jax.nn.sigmoid(lin_ref[...] + add_term + mlp_out)   # (1, TB)


def _fold_params(params, eps=1e-5):
    """Host-side folding of the two eval-mode BatchNorms and the conti Linears."""
    f32 = jnp.float32
    s0 = params["bn0_g"] / jnp.sqrt(params["bn0_v"] + eps)             # (E,)
    t0 = params["bn0_b"] - params["bn0_m"] * s0
    s1 = params["bn1_g"] / jnp.sqrt(params["bn1_v"] + eps)             # (H,)
    t1 = params["bn1_b"] - params["bn1_m"] * s1
    w1, b1 = params["w1"], params["b1"]                                # (H, E), (H,)
    w1f = (s1[:, None] * w1) * s0[None, :]                             # BN1 ∘ Linear ∘ BN0
    b1f = s1 * (b1 + w1 @ t0) + t1                                     # (H,)
    w_cat = jnp.concatenate([params["w_emb"], params["w_add"]], axis=0)          # (E+1, C)
    b_cat = jnp.concatenate([params["b_emb"], jnp.zeros((1,), f32)])[:, None]    # (E+1, 1)
    return w_cat, b_cat, w1f, b1f[:, None].astype(f32), params["w2"]


def _choose_tb(B):
    """Batch-tile size: tiny batches run in one step; otherwise >=2 steps (v7x has 2 TCs)
    with tiles that are a multiple of 128 lanes, capped at _TB_MAX."""
    if B <= 128:
        return B
    half = -(-B // 2)                      # ceil(B / 2)
    tb = -(-half // 128) * 128             # round up to a multiple of 128
    return min(tb, _TB_MAX)


def nfm_content_forward(x, conti_x, params):
    """x: int32 (B, F) field indices; conti_x: float32 (B, C). Returns (B,)."""
    B, _ = x.shape
    E, C = params["w_emb"].shape
    H = params["w1"].shape[0]

    # Glue: data-dependent embedding gathers + field-axis reductions.  The einsums reduce
    # over the field axis and emit the (E, B) batch-on-lane layout directly (no separate
    # (B, E) materialize + transpose).
    idx = x + params["offsets"][None, :]                               # (B, F)
    embed_x = params["emb_table"][idx]                                 # (B, F, E)
    sum_emb_t = jnp.einsum("bfe->eb", embed_x)                         # (E, B)
    sum_sq_t = jnp.einsum("bfe,bfe->eb", embed_x, embed_x)             # (E, B)
    conti_t = conti_x.astype(jnp.float32).T                            # (C, B)
    lin_sum_t = (jnp.sum(params["lin_table"][idx][..., 0], axis=1)
                 + params["lin_bias"] + params["b2"])[None, :]         # (1, B) f32

    # Single bf16 activation slab streamed per batch tile: [sum_emb; sum_sq; conti].
    act = jnp.concatenate([sum_emb_t, sum_sq_t, conti_t],
                          axis=0).astype(jnp.bfloat16)                 # (2E+C, B)
    R = 2 * E + C

    w_cat, b_cat, w1f, b1f, w2 = _fold_params(params)

    TB = _choose_tb(B)
    grid = (pl.cdiv(B, TB),)
    tile = lambda rows: pl.BlockSpec((rows, TB), lambda i: (0, i))     # batch-tiled stream
    const = lambda shape: pl.BlockSpec(shape, lambda i: (0, 0))        # VMEM-resident

    out = pl.pallas_call(
        _nfm_kernel,
        out_shape=jax.ShapeDtypeStruct((1, B), jnp.float32),
        grid=grid,
        in_specs=[tile(R), tile(1),
                  const((E + 1, C)), const((E + 1, 1)),
                  const((H, E)), const((H, 1)), const((1, H))],
        out_specs=tile(1),
        compiler_params=pltpu.CompilerParams(
            dimension_semantics=("parallel",)),
    )(act, lin_sum_t, w_cat, b_cat, w1f, b1f, w2)
    return out[0, :]


def init_params(key, field_dims, embed_dim, mlp_dim, conti_dim):
    ks = jax.random.split(key, 16)
    total = int(np.sum(field_dims))
    f32 = jnp.float32

    def xavier(k, shape):
        fan_out, fan_in = shape
        std = np.sqrt(2.0 / (fan_in + fan_out))
        return jax.random.normal(k, shape, f32) * std

    p = {}
    p["offsets"] = jnp.asarray(np.concatenate(([0], np.cumsum(field_dims)[:-1])),
                               dtype=jnp.int32)                        # (F,)
    p["emb_table"] = xavier(ks[0], (total, embed_dim))                 # FeaturesEmbedding
    p["lin_table"] = xavier(ks[1], (total, 1))                         # FeaturesLinear.fc
    p["lin_bias"] = 0.01 * jax.random.normal(ks[2], (), f32)

    # emb_linear: Linear(conti_dim, embed_dim), xavier_normal_; add_linear: no bias.
    p["w_emb"] = xavier(ks[3], (embed_dim, conti_dim))                 # (E, C)
    p["b_emb"] = 0.01 * jax.random.normal(ks[4], (embed_dim,), f32)
    p["w_add"] = xavier(ks[5], (1, conti_dim))                         # (1, C)

    # BatchNorm1d(embed_dim) inside fm -- eval-mode stats (randomized slightly so the
    # host-side BN folding is actually exercised by the correctness check).
    p["bn0_g"] = 1.0 + 0.1 * jax.random.normal(ks[6], (embed_dim,), f32)
    p["bn0_b"] = 0.1 * jax.random.normal(ks[7], (embed_dim,), f32)
    p["bn0_m"] = 0.1 * jax.random.normal(ks[8], (embed_dim,), f32)
    p["bn0_v"] = 1.0 + 0.1 * jax.random.uniform(ks[9], (embed_dim,), f32)

    # MLP: Linear(E, H), BN(H), ReLU, Dropout, Linear(H, 1)
    p["w1"] = xavier(ks[10], (mlp_dim, embed_dim))                     # (H, E)
    p["b1"] = 0.01 * jax.random.normal(ks[11], (mlp_dim,), f32)
    p["bn1_g"] = 1.0 + 0.1 * jax.random.normal(ks[12], (mlp_dim,), f32)
    p["bn1_b"] = 0.1 * jax.random.normal(ks[13], (mlp_dim,), f32)
    p["bn1_m"] = 0.1 * jax.random.normal(ks[14], (mlp_dim,), f32)
    p["bn1_v"] = 1.0 + 0.1 * jax.random.uniform(ks[15], (mlp_dim,), f32)
    p["w2"] = xavier(jax.random.fold_in(key, 99), (1, mlp_dim))        # (1, H)
    p["b2"] = 0.01 * jax.random.normal(jax.random.fold_in(key, 100), (), f32)
    return p


def nfm_content_reference(x, conti_x, params):
    """Pure-JAX f32 reference of the PyTorch forward pass (eval mode), un-folded."""
    eps = 1e-5
    idx = x + params["offsets"][None, :]
    embed_x = params["emb_table"][idx]                                 # (B, F, E)
    conti = conti_x.astype(jnp.float32)
    added = conti @ params["w_emb"].T + params["b_emb"][None, :]       # (B, E)
    full = jnp.concatenate([embed_x, added[:, None, :]], axis=1)       # (B, F+1, E)
    cross = 0.5 * (jnp.sum(full, 1) ** 2 - jnp.sum(full ** 2, 1))      # (B, E)
    cross = (cross - params["bn0_m"]) / jnp.sqrt(params["bn0_v"] + eps)
    cross = cross * params["bn0_g"] + params["bn0_b"]
    h = cross @ params["w1"].T + params["b1"]
    h = (h - params["bn1_m"]) / jnp.sqrt(params["bn1_v"] + eps)
    h = jnp.maximum(h * params["bn1_g"] + params["bn1_b"], 0.0)
    mlp_out = h @ params["w2"].T + params["b2"]                        # (B, 1)
    lin = jnp.sum(params["lin_table"][idx][..., 0], 1, keepdims=True) + params["lin_bias"]
    add = conti @ params["w_add"].T                                    # (B, 1)
    return jax.nn.sigmoid(lin + add + mlp_out)[:, 0]


def _make_inputs(key, field_dims, conti_dim, batch):
    kx, kc = jax.random.split(key)
    x = jnp.stack(
        [jax.random.randint(jax.random.fold_in(kx, i), (batch,), 0, d)
         for i, d in enumerate(field_dims)], axis=1).astype(jnp.int32)
    conti_x = jax.random.normal(kc, (batch, conti_dim), jnp.float32)
    return x, conti_x


if __name__ == "__main__":
    # Small shapes consistent with the module's forward pass.
    field_dims = (10, 7, 5)      # num_fields F = 3
    embed_dim = 16
    mlp_dims = (32,)             # single hidden MLP layer
    conti_dim = 8

    key = jax.random.PRNGKey(0)
    kp, kd = jax.random.split(key)
    params = init_params(kp, field_dims, embed_dim, mlp_dims[0], conti_dim)

    # Test 1: tiny batch (single grid step, block == full lane dim).
    # Test 2: batch > 128 (>=2 grid steps, padded last tile) to exercise the tiled path.
    for tag, batch in (("small", 4), ("tiled", 384)):
        x, conti_x = _make_inputs(jax.random.fold_in(kd, hash(tag) & 0xFFFF),
                                  field_dims, conti_dim, batch)
        out = jax.block_until_ready(nfm_content_forward(x, conti_x, params))
        ref = jax.block_until_ready(nfm_content_reference(x, conti_x, params))
        assert out.shape == (batch,)
        # Activations are streamed in bf16 (cross-term arithmetic in f32), so allow a
        # slightly looser tolerance than a pure-f32 path.
        np.testing.assert_allclose(np.asarray(out), np.asarray(ref),
                                   rtol=2e-2, atol=5e-3)
    print("KERNEL_OK")
</pallas_src>

<mosaic_0001>
module attributes {stable_mosaic.version = 11 : i64} {
  func.func @_nfm_kernel(%arg0: i32, %arg1: memref<40x4xbf16, #tpu.memory_space<vmem>>, %arg2: memref<1x4xf32, #tpu.memory_space<vmem>>, %arg3: memref<17x8xf32, #tpu.memory_space<vmem>>, %arg4: memref<17x1xf32, #tpu.memory_space<vmem>>, %arg5: memref<32x16xf32, #tpu.memory_space<vmem>>, %arg6: memref<32x1xf32, #tpu.memory_space<vmem>>, %arg7: memref<1x32xf32, #tpu.memory_space<vmem>>, %arg8: memref<1x4xf32, #tpu.memory_space<vmem>>) attributes {dimension_semantics = [#tpu.dimension_semantics<parallel>], iteration_bounds = array<i64: 1>, scalar_prefetch = 0 : i64, scratch_operands = 0 : i64, tpu.core_type = #tpu.core_type<tc>, window_params = [{transform_indices = @transform_0, window_bounds = array<i64: 40, 4>}, {transform_indices = @transform_1, window_bounds = array<i64: 1, 4>}, {pipeline_mode = #tpu.pipeline_mode<synchronous>, transform_indices = @transform_2, window_bounds = array<i64: 17, 8>}, {pipeline_mode = #tpu.pipeline_mode<synchronous>, transform_indices = @transform_3, window_bounds = array<i64: 17, 1>}, {pipeline_mode = #tpu.pipeline_mode<synchronous>, transform_indices = @transform_4, window_bounds = array<i64: 32, 16>}, {pipeline_mode = #tpu.pipeline_mode<synchronous>, transform_indices = @transform_5, window_bounds = array<i64: 32, 1>}, {pipeline_mode = #tpu.pipeline_mode<synchronous>, transform_indices = @transform_6, window_bounds = array<i64: 1, 32>}, {transform_indices = @transform_7, window_bounds = array<i64: 1, 4>}]} {
    %c0 = arith.constant 0 : index
    %c0_0 = arith.constant 0 : index
    %0 = vector.load %arg1[%c0, %c0_0] : memref<40x4xbf16, #tpu.memory_space<vmem>>, vector<40x4xbf16>
    %1 = arith.extf %0 : vector<40x4xbf16> to vector<40x4xf32>
    %2 = vector.extract_strided_slice %1 {offsets = [0, 0], sizes = [16, 4], strides = [1, 1]} : vector<40x4xf32> to vector<16x4xf32>
    %3 = vector.extract_strided_slice %1 {offsets = [16, 0], sizes = [16, 4], strides = [1, 1]} : vector<40x4xf32> to vector<16x4xf32>
    %4 = vector.extract_strided_slice %1 {offsets = [32, 0], sizes = [8, 4], strides = [1, 1]} : vector<40x4xf32> to vector<8x4xf32>
    %c0_1 = arith.constant 0 : index
    %c0_2 = arith.constant 0 : index
    %5 = vector.load %arg3[%c0_1, %c0_2] : memref<17x8xf32, #tpu.memory_space<vmem>>, vector<17x8xf32>
    %cst = arith.constant dense<0.000000e+00> : vector<17x4xf32>
    %6 = tpu.matmul %5, %4, %cst {dimension_numbers = #tpu.dot_dimension_numbers<[1], [0], [0], [1], [0, 0, 1, 1], [], []>} : vector<17x8xf32>, vector<8x4xf32>, vector<17x4xf32> -> vector<17x4xf32>
    %c0_3 = arith.constant 0 : index
    %c0_4 = arith.constant 0 : index
    %7 = vector.load %arg4[%c0_3, %c0_4] : memref<17x1xf32, #tpu.memory_space<vmem>>, vector<17x1xf32>
    %8 = vector.broadcast %7 : vector<17x1xf32> to vector<17x4xf32>
    %9 = arith.addf %6, %8 : vector<17x4xf32>
    %10 = vector.extract_strided_slice %9 {offsets = [0, 0], sizes = [16, 4], strides = [1, 1]} : vector<17x4xf32> to vector<16x4xf32>
    %11 = vector.extract_strided_slice %9 {offsets = [16, 0], sizes = [1, 4], strides = [1, 1]} : vector<17x4xf32> to vector<1x4xf32>
    %12 = arith.addf %2, %10 : vector<16x4xf32>
    %13 = arith.mulf %10, %10 : vector<16x4xf32>
    %14 = arith.addf %3, %13 : vector<16x4xf32>
    %15 = arith.mulf %12, %12 : vector<16x4xf32>
    %16 = arith.subf %15, %14 : vector<16x4xf32>
    %cst_5 = arith.constant 5.000000e-01 : f32
    %17 = vector.broadcast %cst_5 : f32 to vector<16x4xf32>
    %18 = arith.mulf %17, %16 : vector<16x4xf32>
    %c0_6 = arith.constant 0 : index
    %c0_7 = arith.constant 0 : index
    %19 = vector.load %arg5[%c0_6, %c0_7] : memref<32x16xf32, #tpu.memory_space<vmem>>, vector<32x16xf32>
    %cst_8 = arith.constant dense<0.000000e+00> : vector<32x4xf32>
    %20 = tpu.matmul %19, %18, %cst_8 {dimension_numbers = #tpu.dot_dimension_numbers<[1], [0], [0], [1], [0, 0, 1, 1], [], []>} : vector<32x16xf32>, vector<16x4xf32>, vector<32x4xf32> -> vector<32x4xf32>
    %c0_9 = arith.constant 0 : index
    %c0_10 = arith.constant 0 : index
    %21 = vector.load %arg6[%c0_9, %c0_10] : memref<32x1xf32, #tpu.memory_space<vmem>>, vector<32x1xf32>
    %22 = vector.broadcast %21 : vector<32x1xf32> to vector<32x4xf32>
    %23 = arith.addf %20, %22 : vector<32x4xf32>
    %cst_11 = arith.constant 0.000000e+00 : f32
    %24 = vector.broadcast %cst_11 : f32 to vector<32x4xf32>
    %25 = arith.maximumf %23, %24 : vector<32x4xf32>
    %c0_12 = arith.constant 0 : index
    %c0_13 = arith.constant 0 : index
    %26 = vector.load %arg7[%c0_12, %c0_13] : memref<1x32xf32, #tpu.memory_space<vmem>>, vector<1x32xf32>
    %cst_14 = arith.constant dense<0.000000e+00> : vector<1x4xf32>
    %27 = tpu.matmul %26, %25, %cst_14 {dimension_numbers = #tpu.dot_dimension_numbers<[1], [0], [0], [1], [0, 0, 1, 1], [], []>} : vector<1x32xf32>, vector<32x4xf32>, vector<1x4xf32> -> vector<1x4xf32>
    %c0_15 = arith.constant 0 : index
    %c0_16 = arith.constant 0 : index
    %28 = vector.load %arg2[%c0_15, %c0_16] : memref<1x4xf32, #tpu.memory_space<vmem>>, vector<1x4xf32>
    %29 = arith.addf %28, %11 : vector<1x4xf32>
    %30 = arith.addf %29, %27 : vector<1x4xf32>
    %31 = arith.negf %30 : vector<1x4xf32>
    %32 = math.exp %31 : vector<1x4xf32>
    %cst_17 = arith.constant 1.000000e+00 : f32
    %33 = vector.broadcast %cst_17 : f32 to vector<1x4xf32>
    %34 = arith.addf %33, %32 : vector<1x4xf32>
    %35 = arith.divf %33, %34 : vector<1x4xf32>
    %c0_18 = arith.constant 0 : index
    %c0_19 = arith.constant 0 : index
    %36 = vector.load %arg8[%c0_18, %c0_19] : memref<1x4xf32, #tpu.memory_space<vmem>>, vector<1x4xf32>
    tpu.vector_store %arg8[%c0_18, %c0_19], %35 {strides = array<i32>} : memref<1x4xf32, #tpu.memory_space<vmem>>, vector<1x4xf32>,
    return
  }
  func.func @transform_0(%arg0: i32) -> (i32, i32) {
    %c0_i32 = arith.constant 0 : i32
    %c0_i32_0 = arith.constant 0 : i32
    return %c0_i32, %arg0 : i32, i32
  }
  func.func @transform_1(%arg0: i32) -> (i32, i32) {
    %c0_i32 = arith.constant 0 : i32
    %c0_i32_0 = arith.constant 0 : i32
    return %c0_i32, %arg0 : i32, i32
  }
  func.func @transform_2(%arg0: i32) -> (i32, i32) {
    %c0_i32 = arith.constant 0 : i32
    %c0_i32_0 = arith.constant 0 : i32
    %c0_i32_1 = arith.constant 0 : i32
    return %c0_i32, %c0_i32_0 : i32, i32
  }
  func.func @transform_3(%arg0: i32) -> (i32, i32) {
    %c0_i32 = arith.constant 0 : i32
    %c0_i32_0 = arith.constant 0 : i32
    %c0_i32_1 = arith.constant 0 : i32
    return %c0_i32, %c0_i32_0 : i32, i32
  }
  func.func @transform_4(%arg0: i32) -> (i32, i32) {
    %c0_i32 = arith.constant 0 : i32
    %c0_i32_0 = arith.constant 0 : i32
    %c0_i32_1 = arith.constant 0 : i32
    return %c0_i32, %c0_i32_0 : i32, i32
  }
  func.func @transform_5(%arg0: i32) -> (i32, i32) {
    %c0_i32 = arith.constant 0 : i32
    %c0_i32_0 = arith.constant 0 : i32
    %c0_i32_1 = arith.constant 0 : i32
    return %c0_i32, %c0_i32_0 : i32, i32
  }
  func.func @transform_6(%arg0: i32) -> (i32, i32) {
    %c0_i32 = arith.constant 0 : i32
    %c0_i32_0 = arith.constant 0 : i32
    %c0_i32_1 = arith.constant 0 : i32
    return %c0_i32, %c0_i32_0 : i32, i32
  }
  func.func @transform_7(%arg0: i32) -> (i32, i32) {
    %c0_i32 = arith.constant 0 : i32
    %c0_i32_0 = arith.constant 0 : i32
    return %c0_i32, %arg0 : i32, i32
  }
}

</mosaic_0001>

<bundles_post_ra>
// kernel: tpu_custom_call.1
= control target key start
LH: loop header
LB: loop body
LE: loop exit
PB: predicated region body
PF: predicated region fallthrough
CT: control target
= control target key end

     0   :  { %v505_v1 = vmov 0.0   ;;  %vm58_vm0 = vcmask 64512   ;;  %vm506_vm1 = vmmov 0   ;;  %s630_s0 = inlined_call_operand.vmem [shape: bf16[40,4], index: 0, kind: input, shape index: {}]   ;;  %s631_s1 = inlined_call_operand.vmem [shape: f32[1,4], index: 1, kind: input, shape index: {}]   ;;  %s632_s2 = inlined_call_operand.vmem [shape: f32[17,8], index: 2, kind: input, shape index: {}]   ;;  %s633_s3 = inlined_call_operand.vmem [shape: f32[17,1], index: 3, kind: input, shape index: {}]   ;;  %s634_s4 = inlined_call_operand.vmem [shape: f32[32,16], index: 4, kind: input, shape index: {}]   ;;  %s635_s5 = inlined_call_operand.vmem [shape: f32[32,1], index: 5, kind: input, shape index: {}]   ;;  %s636_s6 = inlined_call_operand.vmem [shape: f32[1,32], index: 6, kind: input, shape index: {}]   ;;  %s637_s7 = inlined_call_operand.hbm [shape: f32[1,4], index: 7, kind: output, shape index: {}]  }
   0x1   :  { %v31_v0 = vld [vmem:[%s630_s0 + $0x10] sm:$0xf]  ;;  %423 = vmatprep.subr.mxu0 %v505_v1  ;;  %465 = vmatprep.subr.mxu1 %v505_v1  ;;  %v37_v3 = vld [vmem:[%s632_s2] sm:$0xff] }
   0x2   :  { %v36_v2 = vunpack.c.l.bf16 %v31_v0  ;;  %v39_v4 = vld [vmem:[%s632_s2 + $0x10] sm:$0x1]  ;;  %425 = vmatprep.mubr.msk.f32.mxu0 %vm506_vm1, %v505_v1  ;;  %431 = vmatprep.mubr.msk.f32.mxu1 %vm506_vm1, %v505_v1  ;;  %v40_v5 = vld [vmem:[%s633_s3] sm:$0xff] }
   0x4   :  { %424 = vmatpush3.msra.mxu0 %v36_v2  ;;  %466 = vmatpush3.msra.mxu1 %v36_v2 }
   0x5   :  { %12 = vsyncpa [#allocation3], 0  ;;  %426 = vmatmul.mubr.msk.f32.vlgmr.msra.gmra.mrb[0].mxu0 %vm58_vm0, %v37_v3  ;;  %432 = vmatmul.mubr.msk.f32.vlgmr.msra.gmra.mrb[0].mxu1 %vm58_vm0, %v39_v4  ;;  %v38_v6 = vld [vmem:[%s632_s2 + $0x8] sm:$0xff]  ;;  %v507_v7 = vmov 0   ;;  %v166_v9 = vld [vmem:[%s635_s5 + $0x10] sm:$0xff]  ;;  %vm188_vm2 = vcmask 130048  }
   0x6   :  { %428 = vmatprep.mubr.msk.f32.mxu0 %vm506_vm1, %v505_v1  ;;  %475 = vset.pattern.permute.xlu0 %v507_v7  ;;  %v41_v8 = vld [vmem:[%s633_s3 + $0x8] sm:$0xff]  ;;  %v42_v10 = vld [vmem:[%s633_s3 + $0x10] sm:$0x1]  ;;  %v160_v11 = vld [vmem:[%s634_s4] sm:$0xff]  ;;  %v508_v47 = vmov 0.0|0.0   ;;  %vm291_vm3 = vcmask 261120  }
   0x7   :  { %45 = vperm.xlu0 %475, %v40_v5   ;;  %476 = vset.pattern.permute.xlu1 %v507_v7  ;;  %v164_v12 = vld [vmem:[%s635_s5] sm:$0xff]  ;;  %v165_v13 = vld [vmem:[%s635_s5 + $0x8] sm:$0xff]  ;;  %v167_v14 = vld [vmem:[%s635_s5 + $0x18] sm:$0xff]  ;;  %s509_s11 = smov [#allocation2]   ;;  %vm374_vm4 = vcmask 24576  }
   0x8   :  { %438 = vmatprep.mubr.msk.f32.mxu1 %vm188_vm2, %v160_v11  ;;  %170 = vperm.xlu1 %476, %v164_v12   ;;  %v400_v15 = vld [vmem:[%s630_s0] sm:$0xff]   ;;  %v407_v17 = vld [vmem:[%s630_s0 + $0x8] sm:$0xff]   ;;  %v162_v45 = vld [vmem:[%s634_s4 + $0x10] sm:$0xff]  ;;  %s382_s12 = sshll.u32 %s509_s11, 4  ;;  %s383_s12 = int_to_ptr.vmem [resolvable:$true] %s382_s12 }
   0x9   :  { %429 = vmatmul.mubr.msk.f32.gmra.mrb[2].mxu0 %vm58_vm0, %v38_v6  ;;  %v401_v18 = vunpack.c.l.bf16 %v400_v15  ;;  %v405_v21 = vunpack.c.l.bf16 %v407_v17  ;;  %v402_v27 = vunpack.c.h.bf16 %v400_v15  ;;  %v406_v32 = vunpack.c.h.bf16 %v407_v17  ;;  %v161_v44 = vld [vmem:[%s634_s4 + $0x8] sm:$0xff]  ;;  %v163_v46 = vld [vmem:[%s634_s4 + $0x18] sm:$0xff]  ;;  %459 = vmatprep.subr.bf16.mxu0 %v508_v47  ;;  %v290_v2 = vld [vmem:[%s636_s6] sm:$0x1]  ;;  %s481_s6 = scalar_lea.vmem %s383_s12, 16  ;;  %s485_s13 = scalar_lea.vmem %s383_s12, 32 }
   0xa   :  { %452 = vmatprep.mubr.msk.f32.mxu0 %vm506_vm1, %v505_v1  ;;  %v365_v6 = vld [vmem:[%s631_s1] sm:$0x1]  ;;  %p482_p0 = scmp.ne.s32.totalorder %s383_s12, %s481_s6  ;;  %p486_p1 = scmp.lt.s32.totalorder %s383_s12, %s383_s12 }
   0xb   :  { %50 = vperm.xlu0 %475, %v41_v8   ;;  %p487_p2 = scmp.lt.s32.totalorder %s485_s13, %s481_s6 }
   0xc   :  { %175 = vperm.xlu1 %476, %v165_v13  }
   0xd   :  { %p488_p3 = por %p487_p2, %p486_p1 }
   0xf   :  { %180 = vperm.xlu0 %475, %v166_v9   ;;  %p489_p4 = pnand %p488_p3, %p482_p0 }
  0x10   :  { %185 = vperm.xlu1 %476, %v167_v14  }
  0x13   :  { %55 = vperm.xlu0 %475, %v42_v10  }
  0x86   :  { %v46_v16 = vpop.permute.xlu0 %45 }
  0x87   :  { %v171_v48 = vpop.permute.xlu1 %170 }
  0x8a   :  { %v51_v28 = vpop.permute.xlu0 %50 }
  0x8b   :  { %v176_v49 = vpop.permute.xlu1 %175 }
  0x8e   :  { %v181_v58 = vpop.permute.xlu0 %180 }
  0x8f   :  { %v186_v55 = vpop.permute.xlu1 %185 }
  0x92   :  { %v56_v3 = vpop.permute.xlu0 %55 }
  0xd8   :  { %v134_v19 = vpop.f32.mrb[0].mxu0  ;;  %v144_v20 = vpop.f32.mrb[0].mxu1 }
  0xd9   :  { %v135_v22 = vadd.f32 %v134_v19, %v46_v16  ;;  %v427_v23 = vpop.f32.mrb[1].mxu0  ;;  %v433_v24 = vpop.f32.mrb[1].mxu1  ;;  %v145_v4 = vadd.f32 %v144_v20, %v56_v3 }
  0xdb   :  { %v148_v25 = vadd.f32 %v401_v18, %v135_v22  ;;  %v150_v26 = vmul.f32 %v135_v22, %v135_v22 }
  0xdc   :  { %v139_v29 = vpop.f32.mrb[2].mxu0 }
  0xdd   :  { %v152_v30 = vadd.f32 %v405_v21, %v150_v26  ;;  %v154_v31 = vmul.f32 %v148_v25, %v148_v25  ;;  %v140_v33 = vadd.f32 %v139_v29, %v51_v28  ;;  %v430_v34 = vpop.f32.mrb[3].mxu0 }
  0xdf   :  { %v149_v35 = vadd.f32 %v402_v27, %v140_v33  ;;  %v151_v36 = vmul.f32 %v140_v33, %v140_v33  ;;  %v156_v37 = vsub.f32 %v154_v31, %v152_v30 }
  0xe1   :  { %v153_v38 = vadd.f32 %v406_v32, %v151_v36  ;;  %v155_v39 = vmul.f32 %v149_v35, %v149_v35  ;;  %v158_v41 = vmul.f32 0.5, %v156_v37 }
  0xe3   :  { %v157_v40 = vsub.f32 %v155_v39, %v153_v38 }
  0xe5   :  { %v159_v42 = vmul.f32 0.5, %v157_v40 }
  0xe7   :  { %v455_v43 = vpack.c.bf16 %v159_v42, %v158_v41 }
  0xe9   :  { %456 = vmatprep.subr.bf16.mxu1 %v455_v43 }
  0xea   :  { %458 = vmatpush3.bf16.msra.mxu1 %v455_v43 }
  0xed   :  { %439 = vmatmul.mubr.msk.f32.vlgmr.msra.gmra.mrb[2].mxu1 %vm188_vm2, %v161_v44 }
  0xee   :  { %441 = vmatprep.mubr.msk.f32.mxu1 %vm188_vm2, %v162_v45 }
  0xf1   :  { %442 = vmatmul.mubr.msk.f32.gmra.mrb[4].mxu1 %vm188_vm2, %v163_v46 }
 0x1c0   :  { %v440_v50 = vpop.f32.mrb[2].mxu1 }
 0x1c1   :  { %v273_v51 = vadd.f32 %v440_v50, %v176_v49  ;;  %v267_v52 = vpop.f32.mrb[3].mxu1 }
 0x1c2   :  { %v268_v53 = vadd.f32 %v267_v52, %v171_v48 }
 0x1c3   :  { %v287_v54 = vmax.f32 %v273_v51, 0.0 }
 0x1c4   :  { %v286_v56 = vmax.f32 %v268_v53, 0.0  ;;  %v443_v57 = vpop.f32.mrb[4].mxu1 }
 0x1c5   :  { %v283_v59 = vadd.f32 %v443_v57, %v186_v55  ;;  %v277_v60 = vpop.f32.mrb[5].mxu1 }
 0x1c6   :  { %v460_v61 = vpack.c.bf16 %v287_v54, %v286_v56  ;;  %v278_v62 = vadd.f32 %v277_v60, %v181_v58 }
 0x1c7   :  { %v289_v63 = vmax.f32 %v283_v59, 0.0 }
 0x1c8   :  { %v288_v0 = vmax.f32 %v278_v62, 0.0  ;;  %461 = vmatpush3.bf16.msra.mxu0 %v460_v61 }
 0x1c9   :  { %462 = vmatprep.subr.bf16.mxu0 %v508_v47 }
 0x1ca   :  { %v463_v1 = vpack.c.bf16 %v289_v63, %v288_v0 }
 0x1cc   :  { %464 = vmatpush3.bf16.msra.mxu0 %v463_v1 }
 0x1cf   :  { %453 = vmatmul.mubr.msk.f32.vlgmr.msra.gmra.mrb[4].mxu0 %vm291_vm3, %v290_v2 }
 0x2a2   :  { %v361_v5 = vpop.f32.mrb[4].mxu0 }
 0x2a3   :  { %v468_v7 = vadd.f32 %v361_v5, %v145_v4  ;;  %v454_v8 = vpop.f32.mrb[5].mxu0 }
 0x2a5   :  { %v469_v9 = vadd.f32 %v468_v7, %v365_v6 }
 0x2a7   :  { %v398_v10 = vmul.f32 -1.442695, %v469_v9 }
 0x2a9   :  { %477 = vpow2.f32 %v398_v10 }
 0x2b3   :  { %v478_v11 = vpop.eup %477 }
 0x2b4   :  { %v371_v12 = vadd.f32 1.0, %v478_v11 }
 0x2b6   :  { %479 = vrcp.f32 %v371_v12 }
 0x2c0   :  { %v480_v13 = vpop.eup %479 }
 0x2c1   :  { %375 = vst.msk [vmem:[#allocation2] sm:$0x1] %vm374_vm4, %v480_v13 }
 0x2c2   :  { %492 = shalt.err (!%p489_p4)
}
 0x2c3   :  { %s493_s15 = scalar_lea.hbm %s637_s7, 16 }
 0x2c4   :  { %p494_p5 = scmp.ne.s32.totalorder %s637_s7, %s493_s15  ;;  %p497_p6 = scmp.lt.u32.totalorder %s493_s15, %s637_s7 }
 0x2c6   :  { %p499_p7 = pnand %p497_p6, %p494_p5 }
 0x2c8   :  { %502 = shalt.err (!%p499_p7)
}
 0x2c9   :  { %385 = dma.vmem_to_hbm [thread:$0]  %s383_s12, 16, %s637_s7, [#allocation3]  }
 0x2ca   :  { %503 = dma.done.wait [#allocation3], 16  }
 0x2cb   :  { %504 = vsyncadd [#allocation3], 4294967280 }
 0x2cc   :  { %389 = vsyncpa [#allocation3], 1 }

</bundles_post_ra>
